<compile_context>
chip_gen: v7x
topology: tpu7x:2x2x1
jax: 0.10.0
libtpu: 0.0.40
codegen_flags: <defaults>
</compile_context>

<pallas_src>
import jax
import jax.numpy as jnp
from jax.experimental import pallas as pl
from jax.experimental.pallas import tpu as pltpu


def _round_up(x, m):
    return (x + m - 1) // m * m


def _two_tower_kernel(
    u_ref,    # (BT, Du)  user features tile
    i_ref,    # (BT, Di)  item features tile
    uw1_ref,  # (Du, H)   bf16
    ub1_ref,  # (1, H)    f32
    uw2_ref,  # (H, E)    bf16
    ub2_ref,  # (1, E)    f32
    iw1_ref,  # (Di, H)   bf16
    ib1_ref,  # (1, H)    f32
    iw2_ref,  # (H, E)    bf16
    ib2_ref,  # (1, E)    f32
    o_ref,    # (1, BT)   sigmoid(score), lane-dense
):
    # User tower.
    u = u_ref[...].astype(jnp.bfloat16)
    uh = jnp.dot(u, uw1_ref[...], preferred_element_type=jnp.float32) + ub1_ref[...]
    uh = jnp.maximum(uh, 0.0).astype(jnp.bfloat16)
    ue = jnp.dot(uh, uw2_ref[...], preferred_element_type=jnp.float32) + ub2_ref[...]

    # Item tower.
    it = i_ref[...].astype(jnp.bfloat16)
    ih = jnp.dot(it, iw1_ref[...], preferred_element_type=jnp.float32) + ib1_ref[...]
    ih = jnp.maximum(ih, 0.0).astype(jnp.bfloat16)
    ie = jnp.dot(ih, iw2_ref[...], preferred_element_type=jnp.float32) + ib2_ref[...]

    # Dot-product score, then relayout to lane-dense (1, BT) BEFORE sigmoid so
    # the EUP/VPU work on fully dense vregs.
    score = jnp.sum(ue * ie, axis=1)                       # (BT,)
    o_ref[...] = jax.nn.sigmoid(score[None, :]).astype(o_ref.dtype)


def two_tower_forward(user_input, item_input, params, *, block_b=2048):
    """TwoTowerModelv1 forward pass as a single fused Pallas kernel.

    user_input: (B, Du) float32 or bfloat16
    item_input: (B, Di) float32 or bfloat16
    params:     dict from prepare_params() (bf16 weights, f32 biases)
    returns:    (B,) f32 sigmoid scores
    """
    B, Du = user_input.shape
    B2, Di = item_input.shape
    assert B == B2, "user/item batch mismatch"
    H = params["uw1"].shape[1]
    E = params["uw2"].shape[1]

    # Batch tile: multiple of 128 (lane-dense output stores), large enough to
    # amortize the ~0.35 us per-grid-step overhead, but capped so there are at
    # least 2 grid steps when the batch allows (v7x megacore sharding).
    eff = max(128, min(block_b, _round_up(pl.cdiv(B, 2), 128)))
    n_blocks = pl.cdiv(B, eff)

    def resident(arr):  # small weights: constant block index -> stays in VMEM
        return pl.BlockSpec(arr.shape, lambda i: (0, 0))

    weight_keys = ("uw1", "ub1", "uw2", "ub2", "iw1", "ib1", "iw2", "ib2")
    weight_bytes = sum(int(params[k].size) * params[k].dtype.itemsize
                       for k in weight_keys)
    cost = pl.CostEstimate(
        flops=2 * B * (Du * H + Di * H + 2 * H * E) + 2 * B * E,
        transcendentals=B,
        bytes_accessed=int(
            B * Du * user_input.dtype.itemsize
            + B * Di * item_input.dtype.itemsize
            + B * 4 + weight_bytes),
    )

    out = pl.pallas_call(
        _two_tower_kernel,
        out_shape=jax.ShapeDtypeStruct((n_blocks, eff), jnp.float32),
        grid=(n_blocks,),
        in_specs=[
            pl.BlockSpec((eff, Du), lambda i: (i, 0)),
            pl.BlockSpec((eff, Di), lambda i: (i, 0)),
            resident(params["uw1"]), resident(params["ub1"]),
            resident(params["uw2"]), resident(params["ub2"]),
            resident(params["iw1"]), resident(params["ib1"]),
            resident(params["iw2"]), resident(params["ib2"]),
        ],
        # Lane-dense output: one (1, eff) row per grid step -> unmasked vst.
        out_specs=pl.BlockSpec((1, eff), lambda i: (i, 0)),
        compiler_params=pltpu.CompilerParams(
            dimension_semantics=("parallel",),
        ),
        cost_estimate=cost,
    )(
        user_input, item_input,
        params["uw1"], params["ub1"], params["uw2"], params["ub2"],
        params["iw1"], params["ib1"], params["iw2"], params["ib2"],
    )
    # Tail rows (beyond B) were computed from out-of-bounds reads; discard.
    return out.reshape(n_blocks * eff)[:B]


def init_params(key, user_input_size, item_input_size, embedding_size=64, hidden=128):
    """Deterministic synthetic init matching the module's parameter shapes.

    Weights stored as (in_features, out_features); biases as (1, out_features).
    """
    ks = jax.random.split(key, 8)

    def lin(kw, kb, fan_in, fan_out):
        bound = 1.0 / jnp.sqrt(fan_in)
        w = jax.random.uniform(kw, (fan_in, fan_out), jnp.float32, -bound, bound)
        b = jax.random.uniform(kb, (1, fan_out), jnp.float32, -bound, bound)
        return w, b

    uw1, ub1 = lin(ks[0], ks[1], user_input_size, hidden)
    uw2, ub2 = lin(ks[2], ks[3], hidden, embedding_size)
    iw1, ib1 = lin(ks[4], ks[5], item_input_size, hidden)
    iw2, ib2 = lin(ks[6], ks[7], hidden, embedding_size)
    return dict(uw1=uw1, ub1=ub1, uw2=uw2, ub2=ub2,
                iw1=iw1, ib1=ib1, iw2=iw2, ib2=ib2)


def prepare_params(p):
    """One-time prep: cast weights to bf16 (MXU operands), keep biases f32."""
    out = {}
    for k, v in p.items():
        out[k] = v.astype(jnp.bfloat16) if k.endswith("w1") or k.endswith("w2") else v
    # keys are uw1/uw2/iw1/iw2 (weights) and ub1/ub2/ib1/ib2 (biases)
    return {k: (v.astype(jnp.bfloat16) if "w" in k else v.astype(jnp.float32))
            for k, v in p.items()}


def reference_forward(user_input, item_input, p):
    """Pure-f32 JAX reference matching the PyTorch module semantics."""
    uh = jnp.maximum(user_input @ p["uw1"] + p["ub1"], 0.0)
    ue = uh @ p["uw2"] + p["ub2"]
    ih = jnp.maximum(item_input @ p["iw1"] + p["ib1"], 0.0)
    ie = ih @ p["iw2"] + p["ib2"]
    return jax.nn.sigmoid(jnp.sum(ue * ie, axis=1))


if __name__ == "__main__":
    key = jax.random.PRNGKey(0)
    k_u, k_i, k_p, k_u2, k_i2 = jax.random.split(key, 5)

    user_input_size = 16
    item_input_size = 24
    embedding_size = 64

    params_f32 = init_params(k_p, user_input_size, item_input_size, embedding_size)
    params = prepare_params(params_f32)

    # --- small case (batch=8 -> one 128-row tile, partial block reads) ---
    batch = 8
    user_input = jax.random.normal(k_u, (batch, user_input_size), jnp.float32)
    item_input = jax.random.normal(k_i, (batch, item_input_size), jnp.float32)

    out = jax.block_until_ready(two_tower_forward(user_input, item_input, params))
    ref = reference_forward(user_input, item_input, params_f32)
    assert out.shape == (batch,)
    # bf16 matmul operands -> looser tolerance than pure f32.
    assert jnp.allclose(out, ref, atol=2e-2, rtol=2e-2), (out, ref)

    # --- multi-tile case (batch=300 -> 2 blocks of 256, second is partial) to
    #     exercise the cdiv grid, megacore split and lane-dense block rows ---
    batch2 = 300
    u2 = jax.random.normal(k_u2, (batch2, user_input_size), jnp.float32)
    i2 = jax.random.normal(k_i2, (batch2, item_input_size), jnp.float32)
    out2 = jax.block_until_ready(two_tower_forward(u2, i2, params))
    ref2 = reference_forward(u2, i2, params_f32)
    assert out2.shape == (batch2,)
    assert jnp.allclose(out2, ref2, atol=2e-2, rtol=2e-2), (out2, ref2)

    # TODO(synk): training utilities (Adam, BCELoss, train_model/predict loops)
    # are host-side logic and intentionally not implemented as kernels.
    print("KERNEL_OK")
</pallas_src>

<mosaic_0001>
module attributes {stable_mosaic.version = 11 : i64} {
  func.func @_two_tower_kernel(%arg0: i32, %arg1: memref<128x16xf32, #tpu.memory_space<vmem>>, %arg2: memref<128x24xf32, #tpu.memory_space<vmem>>, %arg3: memref<16x128xbf16, #tpu.memory_space<vmem>>, %arg4: memref<1x128xf32, #tpu.memory_space<vmem>>, %arg5: memref<128x64xbf16, #tpu.memory_space<vmem>>, %arg6: memref<1x64xf32, #tpu.memory_space<vmem>>, %arg7: memref<24x128xbf16, #tpu.memory_space<vmem>>, %arg8: memref<1x128xf32, #tpu.memory_space<vmem>>, %arg9: memref<128x64xbf16, #tpu.memory_space<vmem>>, %arg10: memref<1x64xf32, #tpu.memory_space<vmem>>, %arg11: memref<1x128xf32, #tpu.memory_space<vmem>>) attributes {dimension_semantics = [#tpu.dimension_semantics<parallel>], iteration_bounds = array<i64: 1>, scalar_prefetch = 0 : i64, scratch_operands = 0 : i64, tpu.core_type = #tpu.core_type<tc>, window_params = [{transform_indices = @transform_0, window_bounds = array<i64: 128, 16>}, {transform_indices = @transform_1, window_bounds = array<i64: 128, 24>}, {pipeline_mode = #tpu.pipeline_mode<synchronous>, transform_indices = @transform_2, window_bounds = array<i64: 16, 128>}, {pipeline_mode = #tpu.pipeline_mode<synchronous>, transform_indices = @transform_3, window_bounds = array<i64: 1, 128>}, {pipeline_mode = #tpu.pipeline_mode<synchronous>, transform_indices = @transform_4, window_bounds = array<i64: 128, 64>}, {pipeline_mode = #tpu.pipeline_mode<synchronous>, transform_indices = @transform_5, window_bounds = array<i64: 1, 64>}, {pipeline_mode = #tpu.pipeline_mode<synchronous>, transform_indices = @transform_6, window_bounds = array<i64: 24, 128>}, {pipeline_mode = #tpu.pipeline_mode<synchronous>, transform_indices = @transform_7, window_bounds = array<i64: 1, 128>}, {pipeline_mode = #tpu.pipeline_mode<synchronous>, transform_indices = @transform_8, window_bounds = array<i64: 128, 64>}, {pipeline_mode = #tpu.pipeline_mode<synchronous>, transform_indices = @transform_9, window_bounds = array<i64: 1, 64>}, {transform_indices = @transform_10, window_bounds = array<i64: 1, 128>}]} {
    %c0 = arith.constant 0 : index
    %c0_0 = arith.constant 0 : index
    %0 = vector.load %arg1[%c0, %c0_0] : memref<128x16xf32, #tpu.memory_space<vmem>>, vector<128x16xf32>
    %1 = arith.truncf %0 : vector<128x16xf32> to vector<128x16xbf16>
    %c0_1 = arith.constant 0 : index
    %c0_2 = arith.constant 0 : index
    %2 = vector.load %arg3[%c0_1, %c0_2] : memref<16x128xbf16, #tpu.memory_space<vmem>>, vector<16x128xbf16>
    %cst = arith.constant dense<0.000000e+00> : vector<128x128xf32>
    %3 = tpu.matmul %1, %2, %cst {dimension_numbers = #tpu.dot_dimension_numbers<[1], [0], [0], [1], [0, 0, 1, 1], [], []>} : vector<128x16xbf16>, vector<16x128xbf16>, vector<128x128xf32> -> vector<128x128xf32>
    %c0_3 = arith.constant 0 : index
    %c0_4 = arith.constant 0 : index
    %4 = vector.load %arg4[%c0_3, %c0_4] : memref<1x128xf32, #tpu.memory_space<vmem>>, vector<1x128xf32>
    %5 = vector.broadcast %4 : vector<1x128xf32> to vector<128x128xf32>
    %6 = arith.addf %3, %5 : vector<128x128xf32>
    %cst_5 = arith.constant 0.000000e+00 : f32
    %7 = vector.broadcast %cst_5 : f32 to vector<128x128xf32>
    %8 = arith.maximumf %6, %7 : vector<128x128xf32>
    %9 = arith.truncf %8 : vector<128x128xf32> to vector<128x128xbf16>
    %c0_6 = arith.constant 0 : index
    %c0_7 = arith.constant 0 : index
    %10 = vector.load %arg5[%c0_6, %c0_7] : memref<128x64xbf16, #tpu.memory_space<vmem>>, vector<128x64xbf16>
    %cst_8 = arith.constant dense<0.000000e+00> : vector<128x64xf32>
    %11 = tpu.matmul %9, %10, %cst_8 {dimension_numbers = #tpu.dot_dimension_numbers<[1], [0], [0], [1], [0, 0, 1, 1], [], []>} : vector<128x128xbf16>, vector<128x64xbf16>, vector<128x64xf32> -> vector<128x64xf32>
    %c0_9 = arith.constant 0 : index
    %c0_10 = arith.constant 0 : index
    %12 = vector.load %arg6[%c0_9, %c0_10] : memref<1x64xf32, #tpu.memory_space<vmem>>, vector<1x64xf32>
    %13 = vector.broadcast %12 : vector<1x64xf32> to vector<128x64xf32>
    %14 = arith.addf %11, %13 : vector<128x64xf32>
    %c0_11 = arith.constant 0 : index
    %c0_12 = arith.constant 0 : index
    %15 = vector.load %arg2[%c0_11, %c0_12] : memref<128x24xf32, #tpu.memory_space<vmem>>, vector<128x24xf32>
    %16 = arith.truncf %15 : vector<128x24xf32> to vector<128x24xbf16>
    %c0_13 = arith.constant 0 : index
    %c0_14 = arith.constant 0 : index
    %17 = vector.load %arg7[%c0_13, %c0_14] : memref<24x128xbf16, #tpu.memory_space<vmem>>, vector<24x128xbf16>
    %cst_15 = arith.constant dense<0.000000e+00> : vector<128x128xf32>
    %18 = tpu.matmul %16, %17, %cst_15 {dimension_numbers = #tpu.dot_dimension_numbers<[1], [0], [0], [1], [0, 0, 1, 1], [], []>} : vector<128x24xbf16>, vector<24x128xbf16>, vector<128x128xf32> -> vector<128x128xf32>
    %c0_16 = arith.constant 0 : index
    %c0_17 = arith.constant 0 : index
    %19 = vector.load %arg8[%c0_16, %c0_17] : memref<1x128xf32, #tpu.memory_space<vmem>>, vector<1x128xf32>
    %20 = vector.broadcast %19 : vector<1x128xf32> to vector<128x128xf32>
    %21 = arith.addf %18, %20 : vector<128x128xf32>
    %cst_18 = arith.constant 0.000000e+00 : f32
    %22 = vector.broadcast %cst_18 : f32 to vector<128x128xf32>
    %23 = arith.maximumf %21, %22 : vector<128x128xf32>
    %24 = arith.truncf %23 : vector<128x128xf32> to vector<128x128xbf16>
    %c0_19 = arith.constant 0 : index
    %c0_20 = arith.constant 0 : index
    %25 = vector.load %arg9[%c0_19, %c0_20] : memref<128x64xbf16, #tpu.memory_space<vmem>>, vector<128x64xbf16>
    %cst_21 = arith.constant dense<0.000000e+00> : vector<128x64xf32>
    %26 = tpu.matmul %24, %25, %cst_21 {dimension_numbers = #tpu.dot_dimension_numbers<[1], [0], [0], [1], [0, 0, 1, 1], [], []>} : vector<128x128xbf16>, vector<128x64xbf16>, vector<128x64xf32> -> vector<128x64xf32>
    %c0_22 = arith.constant 0 : index
    %c0_23 = arith.constant 0 : index
    %27 = vector.load %arg10[%c0_22, %c0_23] : memref<1x64xf32, #tpu.memory_space<vmem>>, vector<1x64xf32>
    %28 = vector.broadcast %27 : vector<1x64xf32> to vector<128x64xf32>
    %29 = arith.addf %26, %28 : vector<128x64xf32>
    %30 = arith.mulf %14, %29 : vector<128x64xf32>
    %cst_24 = arith.constant dense<0.000000e+00> : vector<128xf32>
    %31 = vector.multi_reduction <add>, %30, %cst_24 [1] : vector<128x64xf32> to vector<128xf32>
    %32 = vector.shape_cast %31 : vector<128xf32> to vector<1x128xf32>
    %33 = arith.negf %32 : vector<1x128xf32>
    %34 = math.exp %33 : vector<1x128xf32>
    %cst_25 = arith.constant 1.000000e+00 : f32
    %35 = vector.broadcast %cst_25 : f32 to vector<1x128xf32>
    %36 = arith.addf %35, %34 : vector<1x128xf32>
    %37 = arith.divf %35, %36 : vector<1x128xf32>
    %c0_26 = arith.constant 0 : index
    %c0_27 = arith.constant 0 : index
    %38 = vector.load %arg11[%c0_26, %c0_27] : memref<1x128xf32, #tpu.memory_space<vmem>>, vector<1x128xf32>
    tpu.vector_store %arg11[%c0_26, %c0_27], %37 {strides = array<i32>} : memref<1x128xf32, #tpu.memory_space<vmem>>, vector<1x128xf32>,
    return
  }
  func.func @transform_0(%arg0: i32) -> (i32, i32) {
    %c0_i32 = arith.constant 0 : i32
    %c0_i32_0 = arith.constant 0 : i32
    return %arg0, %c0_i32 : i32, i32
  }
  func.func @transform_1(%arg0: i32) -> (i32, i32) {
    %c0_i32 = arith.constant 0 : i32
    %c0_i32_0 = arith.constant 0 : i32
    return %arg0, %c0_i32 : i32, i32
  }
  func.func @transform_2(%arg0: i32) -> (i32, i32) {
    %c0_i32 = arith.constant 0 : i32
    %c0_i32_0 = arith.constant 0 : i32
    %c0_i32_1 = arith.constant 0 : i32
    return %c0_i32, %c0_i32_0 : i32, i32
  }
  func.func @transform_3(%arg0: i32) -> (i32, i32) {
    %c0_i32 = arith.constant 0 : i32
    %c0_i32_0 = arith.constant 0 : i32
    %c0_i32_1 = arith.constant 0 : i32
    return %c0_i32, %c0_i32_0 : i32, i32
  }
  func.func @transform_4(%arg0: i32) -> (i32, i32) {
    %c0_i32 = arith.constant 0 : i32
    %c0_i32_0 = arith.constant 0 : i32
    %c0_i32_1 = arith.constant 0 : i32
    return %c0_i32, %c0_i32_0 : i32, i32
  }
  func.func @transform_5(%arg0: i32) -> (i32, i32) {
    %c0_i32 = arith.constant 0 : i32
    %c0_i32_0 = arith.constant 0 : i32
    %c0_i32_1 = arith.constant 0 : i32
    return %c0_i32, %c0_i32_0 : i32, i32
  }
  func.func @transform_6(%arg0: i32) -> (i32, i32) {
    %c0_i32 = arith.constant 0 : i32
    %c0_i32_0 = arith.constant 0 : i32
    %c0_i32_1 = arith.constant 0 : i32
    return %c0_i32, %c0_i32_0 : i32, i32
  }
  func.func @transform_7(%arg0: i32) -> (i32, i32) {
    %c0_i32 = arith.constant 0 : i32
    %c0_i32_0 = arith.constant 0 : i32
    %c0_i32_1 = arith.constant 0 : i32
    return %c0_i32, %c0_i32_0 : i32, i32
  }
  func.func @transform_8(%arg0: i32) -> (i32, i32) {
    %c0_i32 = arith.constant 0 : i32
    %c0_i32_0 = arith.constant 0 : i32
    %c0_i32_1 = arith.constant 0 : i32
    return %c0_i32, %c0_i32_0 : i32, i32
  }
  func.func @transform_9(%arg0: i32) -> (i32, i32) {
    %c0_i32 = arith.constant 0 : i32
    %c0_i32_0 = arith.constant 0 : i32
    %c0_i32_1 = arith.constant 0 : i32
    return %c0_i32, %c0_i32_0 : i32, i32
  }
  func.func @transform_10(%arg0: i32) -> (i32, i32) {
    %c0_i32 = arith.constant 0 : i32
    %c0_i32_0 = arith.constant 0 : i32
    return %arg0, %c0_i32 : i32, i32
  }
}

</mosaic_0001>

<bundles_post_ra>
// kernel: tpu_custom_call.1
= control target key start
LH: loop header
LB: loop body
LE: loop exit
PB: predicated region body
PF: predicated region fallthrough
CT: control target
= control target key end

     0   :  { %vm76_vm0 = vcmask 130048   ;;  %vm458_vm1 = vcmask 1043456   ;;  %s1817_s0 = inlined_call_operand.vmem [shape: f32[8,16], index: 0, kind: input, shape index: {}]   ;;  %s1818_s1 = inlined_call_operand.vmem [shape: f32[8,24], index: 1, kind: input, shape index: {}]   ;;  %s1819_s2 = inlined_call_operand.vmem [shape: bf16[16,128], index: 2, kind: input, shape index: {}]   ;;  %s1820_s3 = inlined_call_operand.vmem [shape: f32[1,128], index: 3, kind: input, shape index: {}]   ;;  %s1821_s4 = inlined_call_operand.vmem [shape: bf16[128,64], index: 4, kind: input, shape index: {}]   ;;  %s1822_s5 = inlined_call_operand.vmem [shape: f32[1,64], index: 5, kind: input, shape index: {}]   ;;  %s1823_s6 = inlined_call_operand.vmem [shape: bf16[24,128], index: 6, kind: input, shape index: {}]   ;;  %s1824_s7 = inlined_call_operand.vmem [shape: f32[1,128], index: 7, kind: input, shape index: {}]   ;;  %s1825_s8 = inlined_call_operand.vmem [shape: bf16[128,64], index: 8, kind: input, shape index: {}]   ;;  %s1826_s9 = inlined_call_operand.vmem [shape: f32[1,64], index: 9, kind: input, shape index: {}]   ;;  %s1827_s10 = inlined_call_operand.hbm [shape: f32[1,128], index: 10, kind: output, shape index: {}]  }
   0x1   :  { %v1281_v0 = vld [vmem:[%s1819_s2] sm:$0xff]   ;;  %v38_v2 = vld [vmem:[%s1817_s0 + $0x8] sm:$0xff]  ;;  %v39_v3 = vld [vmem:[%s1817_s0 + $0x10] sm:$0xff] }
   0x2   :  { %v37_v1 = vld [vmem:[%s1817_s0] sm:$0xff]  ;;  %1161 = vmatprep.subr.bf16.mxu0 %v1281_v0  ;;  %v40_v5 = vld [vmem:[%s1817_s0 + $0x18] sm:$0xff]  ;;  %v42_v9 = vld [vmem:[%s1817_s0 + $0x28] sm:$0xff] }
   0x3   :  { %v53_v4 = vpack.c.bf16 %v38_v2, %v37_v1  ;;  %1162 = vmatpush3.bf16.msra.mxu0 %v1281_v0  ;;  %v54_v6 = vpack.c.bf16 %v40_v5, %v39_v3  ;;  %v1282_v7 = vld [vmem:[%s1823_s6] sm:$0xff]   ;;  %v1283_v11 = vld [vmem:[%s1823_s6 + $0x8] ss:$0 sps:$4 sm:$0xff]   ;;  %v43_v12 = vld [vmem:[%s1817_s0 + $0x30] sm:$0xff] }
   0x4   :  { %v41_v8 = vld [vmem:[%s1817_s0 + $0x20] sm:$0xff]  ;;  %1211 = vmatprep.subr.bf16.mxu0 %v1282_v7  ;;  %v44_v13 = vld [vmem:[%s1817_s0 + $0x38] sm:$0xff]  ;;  %v46_v15 = vld [vmem:[%s1817_s0 + $0x48] sm:$0xff]  ;;  %v460_v16 = vsel %vm458_vm1, %v1283_v11, 0 }
   0x5   :  { %1163 = vmatprep.mubr.msk.bf16.mxu0 %vm76_vm0, %v53_v4  ;;  %v55_v10 = vpack.c.bf16 %v42_v9, %v41_v8  ;;  %v45_v14 = vld [vmem:[%s1817_s0 + $0x40] sm:$0xff]  ;;  %v56_v17 = vpack.c.bf16 %v44_v13, %v43_v12  ;;  %v47_v19 = vld [vmem:[%s1817_s0 + $0x50] sm:$0xff]  ;;  %v48_v20 = vld [vmem:[%s1817_s0 + $0x58] sm:$0xff] }
   0x6   :  { %1164 = vmatmul.mubr.msk.bf16.vlgmr.msra.gmra.mrb[0].mxu0 %vm76_vm0, %v54_v6  ;;  %v57_v18 = vpack.c.bf16 %v46_v15, %v45_v14  ;;  %v49_v21 = vld [vmem:[%s1817_s0 + $0x60] sm:$0xff]  ;;  %v1285_v23 = vld [vmem:[%s1821_s4 + $0x8] sm:$0xff]   ;;  %v58_v25 = vpack.c.bf16 %v48_v20, %v47_v19  ;;  %v1286_v26 = vld [vmem:[%s1821_s4 + $0x10] sm:$0xff]  }
   0x7   :  { %1212 = vmatpush3.bf16.msra.mxu0 %v1282_v7  ;;  %1167 = vmatprep.mubr.msk.bf16.mxu0 %vm76_vm0, %v55_v10  ;;  %v1284_v22 = vld [vmem:[%s1821_s4] sm:$0xff]   ;;  %v50_v24 = vld [vmem:[%s1817_s0 + $0x68] sm:$0xff]  ;;  %v1287_v28 = vld [vmem:[%s1821_s4 + $0x18] sm:$0xff]  }
   0x8   :  { %1279 = vmatprep.subr.msk.bf16.mxu0 %vm458_vm1, %v1283_v11  ;;  %1179 = vmatprep.subr.bf16.mxu1 %v1284_v22  ;;  %v59_v27 = vpack.c.bf16 %v50_v24, %v49_v21  ;;  %v51_v29 = vld [vmem:[%s1817_s0 + $0x70] sm:$0xff]  ;;  %v52_v30 = vld [vmem:[%s1817_s0 + $0x78] sm:$0xff]  ;;  %v390_v31 = vld [vmem:[%s1818_s1] sm:$0xff] }
   0x9   :  { %1180 = vmatpush3.bf16.msra.mxu1 %v1284_v22  ;;  %v391_v32 = vld [vmem:[%s1818_s1 + $0x8] sm:$0xff]  ;;  %v60_v33 = vpack.c.bf16 %v52_v30, %v51_v29  ;;  %v1288_v34 = vld [vmem:[%s1821_s4 + $0x20] sm:$0xff]  }
   0xa   :  { %1181 = vmatprep.subr.bf16.mxu1 %v1285_v23 }
   0xb   :  { %1214 = vmatpush3.bf16.msra.mxu0 %v460_v16 }
   0xd   :  { %1182 = vmatpush3.bf16.msra.mxu1 %v1285_v23 }
   0xe   :  { %1168 = vmatmul.mubr.msk.bf16.gmra.mrb[4].mxu0 %vm76_vm0, %v56_v17  ;;  %1183 = vmatprep.subr.bf16.mxu1 %v1286_v26 }
   0xf   :  { %1171 = vmatprep.mubr.msk.bf16.mxu0 %vm76_vm0, %v57_v18 }
  0x11   :  { %1184 = vmatpush3.bf16.msra.mxu1 %v1286_v26 }
  0x12   :  { %1185 = vmatprep.subr.bf16.mxu1 %v1287_v28 }
  0x16   :  { %1172 = vmatmul.mubr.msk.bf16.gmra.mrb[8].mxu0 %vm76_vm0, %v58_v25 }
  0x17   :  { %1175 = vmatprep.mubr.msk.bf16.mxu0 %vm76_vm0, %v59_v27 }
  0x18   :  { %15 = vsyncpa [#allocation3], 0  ;;  %v406_v35 = vpack.c.bf16 %v391_v32, %v390_v31  ;;  %vm433_vm2 = vcmask 195584   ;;  %1186 = vmatpush3.bf16.msra.mxu1 %v1287_v28  ;;  %v1289_v36 = vld [vmem:[%s1821_s4 + $0x28] sm:$0xff]   ;;  %v392_v37 = vld [vmem:[%s1818_s1 + $0x10] sm:$0xff]  ;;  %vm767_vm3 = vcmask 523264  }
  0x19   :  { %1187 = vmatprep.subr.bf16.mxu1 %v1288_v34  ;;  %v393_v38 = vld [vmem:[%s1818_s1 + $0x18] sm:$0xff]  ;;  %v394_v39 = vld [vmem:[%s1818_s1 + $0x20] sm:$0xff]  ;;  %v395_v40 = vld [vmem:[%s1818_s1 + $0x28] sm:$0xff]  ;;  %vm939_vm4 = vcmask 130112   ;;  %vm946_vm5 = vcmask 195712   ;;  %vm953_vm6 = vcmask 261312  }
  0x1a   :  { %v407_v41 = vpack.c.bf16 %v393_v38, %v392_v37  ;;  %v408_v42 = vpack.c.bf16 %v395_v40, %v394_v39  ;;  %v396_v43 = vld [vmem:[%s1818_s1 + $0x30] sm:$0xff]  ;;  %v397_v44 = vld [vmem:[%s1818_s1 + $0x38] sm:$0xff]  ;;  %v398_v45 = vld [vmem:[%s1818_s1 + $0x40] sm:$0xff]  ;;  %vm960_vm7 = vcmask 326912   ;;  %vm967_vm8 = vcmask 392512  }
  0x1b   :  { %v399_v46 = vld [vmem:[%s1818_s1 + $0x48] sm:$0xff]  ;;  %v409_v47 = vpack.c.bf16 %v397_v44, %v396_v43  ;;  %v400_v49 = vld [vmem:[%s1818_s1 + $0x50] sm:$0xff]  ;;  %v401_v50 = vld [vmem:[%s1818_s1 + $0x58] sm:$0xff]  ;;  %vm974_vm9 = vcmask 458112   ;;  %vm981_vm10 = vcmask 523712   ;;  %vm988_vm11 = vcmask 589312  }
  0x1c   :  { %1188 = vmatpush3.bf16.msra.mxu1 %v1288_v34  ;;  %v410_v48 = vpack.c.bf16 %v399_v46, %v398_v45  ;;  %v402_v51 = vld [vmem:[%s1818_s1 + $0x60] sm:$0xff]  ;;  %v403_v52 = vld [vmem:[%s1818_s1 + $0x68] sm:$0xff]  ;;  %v411_v53 = vpack.c.bf16 %v401_v50, %v400_v49  ;;  %v404_v55 = vld [vmem:[%s1818_s1 + $0x70] sm:$0xff]  ;;  %vm995_vm12 = vcmask 654912   ;;  %vm1002_vm13 = vcmask 720512  }
  0x1d   :  { %1189 = vmatprep.subr.bf16.mxu1 %v1289_v36  ;;  %v412_v54 = vpack.c.bf16 %v403_v52, %v402_v51  ;;  %v405_v56 = vld [vmem:[%s1818_s1 + $0x78] sm:$0xff]  ;;  %v1290_v58 = vld [vmem:[%s1821_s4 + $0x30] sm:$0xff]   ;;  %v1292_v60 = vld [vmem:[%s1825_s8] sm:$0xff]   ;;  %vm1009_vm14 = vcmask 786112   ;;  %vm1016_vm15 = vcmask 851712   ;;  %vm1030_vm1 = vcmask 982912  }
  0x1e   :  { %1176 = vmatmul.mubr.msk.bf16.gmra.mrb[12].mxu0 %vm76_vm0, %v60_v33  ;;  %v413_v57 = vpack.c.bf16 %v405_v56, %v404_v55  ;;  %v1291_v59 = vld [vmem:[%s1821_s4 + $0x38] sm:$0xff]   ;;  %1231 = vmatprep.subr.bf16.mxu0 %v1292_v60  ;;  %v1293_v61 = vld [vmem:[%s1825_s8 + $0x8] sm:$0xff]   ;;  %v1598_v62 = vld [vmem:[%s1825_s8 + $0x10] sm:$0xff]   ;;  %vm1023_vm0 = vcmask 917312  }
  0x1f   :  { %1215 = vmatprep.mubr.msk.bf16.mxu0 %vm433_vm2, %v406_v35  ;;  %v1605_v63 = vld [vmem:[%s1825_s8 + $0x18] sm:$0xff]   ;;  %v1612_v0 = vld [vmem:[%s1825_s8 + $0x20] sm:$0xff]   ;;  %v1619_v1 = vld [vmem:[%s1825_s8 + $0x28] sm:$0xff]  }
  0x20   :  { %1190 = vmatpush3.bf16.msra.mxu1 %v1289_v36  ;;  %v1626_v2 = vld [vmem:[%s1825_s8 + $0x30] sm:$0xff]   ;;  %v1633_v3 = vld [vmem:[%s1825_s8 + $0x38] sm:$0xff]   ;;  %v1640_v4 = vld [vmem:[%s1820_s3] ss:$0 sm:$0xff] }
  0x21   :  { %1191 = vmatprep.subr.bf16.mxu1 %v1290_v58 }
  0x24   :  { %1192 = vmatpush3.bf16.msra.mxu1 %v1290_v58 }
  0x25   :  { %1193 = vmatprep.subr.bf16.mxu1 %v1291_v59 }
  0x26   :  { %1216 = vmatmul.mubr.msk.bf16.vlgmr.msra.gmra.mrb[16].mxu0 %vm433_vm2, %v407_v41 }
  0x27   :  { %1219 = vmatprep.mubr.msk.bf16.mxu0 %vm433_vm2, %v408_v42  ;;  %1232 = vmatpush3.bf16.msra.mxu0 %v1292_v60 }
  0x28   :  { %1194 = vmatpush3.bf16.msra.mxu1 %v1291_v59  ;;  %1233 = vmatprep.subr.bf16.mxu0 %v1293_v61  ;;  %v1668_v59 = vld [vmem:[%s1824_s7] ss:$0 sm:$0xff] }
  0x29   :  { %1263 = vmatprep.subr.bf16.mxu1 %v1292_v60 }
  0x2b   :  { %1234 = vmatpush3.bf16.msra.mxu0 %v1293_v61 }
  0x2c   :  { %1235 = vmatprep.subr.bf16.mxu0 %v1598_v62 }
  0x2e   :  { %1220 = vmatmul.mubr.msk.bf16.gmra.mrb[20].mxu0 %vm433_vm2, %v409_v47 }
  0x2f   :  { %1223 = vmatprep.mubr.msk.bf16.mxu0 %vm433_vm2, %v410_v48  ;;  %1236 = vmatpush3.bf16.msra.mxu0 %v1598_v62 }
  0x30   :  { %1237 = vmatprep.subr.bf16.mxu0 %v1605_v63 }
  0x33   :  { %1238 = vmatpush3.bf16.msra.mxu0 %v1605_v63 }
  0x34   :  { %1239 = vmatprep.subr.bf16.mxu0 %v1612_v0 }
  0x36   :  { %1224 = vmatmul.mubr.msk.bf16.gmra.mrb[24].mxu0 %vm433_vm2, %v411_v53 }
  0x37   :  { %1227 = vmatprep.mubr.msk.bf16.mxu0 %vm433_vm2, %v412_v54  ;;  %1240 = vmatpush3.bf16.msra.mxu0 %v1612_v0 }
  0x38   :  { %1241 = vmatprep.subr.bf16.mxu0 %v1619_v1 }
  0x3b   :  { %1242 = vmatpush3.bf16.msra.mxu0 %v1619_v1 }
  0x3c   :  { %1243 = vmatprep.subr.bf16.mxu0 %v1626_v2 }
  0x3e   :  { %1228 = vmatmul.mubr.msk.bf16.gmra.mrb[28].mxu0 %vm433_vm2, %v413_v57  ;;  %vm1037_vm2 = vcmask 1048512  }
  0x3f   :  { %1244 = vmatpush3.bf16.msra.mxu0 %v1626_v2 }
  0x40   :  { %1245 = vmatprep.subr.bf16.mxu0 %v1633_v3 }
  0x43   :  { %1246 = vmatpush3.bf16.msra.mxu0 %v1633_v3 }
  0xd9   :  { %v1165_v5 = vpop.f32.mrb[0].mxu0 }
  0xda   :  { %v144_v6 = vadd.f32 %v1165_v5, %v1640_v4  ;;  %v135_v7 = vpop.f32.mrb[1].mxu0 }
  0xdb   :  { %v136_v8 = vadd.f32 %v1640_v4, %v135_v7  ;;  %v1166_v9 = vpop.f32.mrb[2].mxu0 }
  0xdc   :  { %v147_v10 = vadd.f32 %v1166_v9, %v1640_v4  ;;  %v138_v11 = vpop.f32.mrb[3].mxu0  ;;  %v200_v13 = vmax.f32 %v144_v6, 0.0 }
  0xdd   :  { %v139_v12 = vadd.f32 %v1640_v4, %v138_v11  ;;  %v198_v15 = vmax.f32 %v136_v8, 0.0 }
  0xde   :  { %v201_v14 = vmax.f32 %v147_v10, 0.0 }
  0xdf   :  { %v199_v16 = vmax.f32 %v139_v12, 0.0 }
  0xe0   :  { %v215_v17 = vpack.c.bf16 %v201_v14, %v200_v13 }
  0xe1   :  { %v1169_v18 = vpop.f32.mrb[4].mxu0  ;;  %v214_v19 = vpack.c.bf16 %v199_v16, %v198_v15 }
  0xe2   :  { %v160_v20 = vadd.f32 %v1169_v18, %v1640_v4  ;;  %v151_v21 = vpop.f32.mrb[5].mxu0 }
  0xe3   :  { %v152_v22 = vadd.f32 %v1640_v4, %v151_v21  ;;  %v1170_v23 = vpop.f32.mrb[6].mxu0  ;;  %1195 = vmatprep.mubr.bf16.mxu1 %v214_v19 }
  0xe4   :  { %v163_v24 = vadd.f32 %v1170_v23, %v1640_v4  ;;  %v154_v25 = vpop.f32.mrb[7].mxu0  ;;  %1196 = vmatmul.mubr.bf16.vlgmr.msra.gmra.mrb[0].mxu1 %v215_v17  ;;  %v204_v27 = vmax.f32 %v160_v20, 0.0 }
  0xe5   :  { %v155_v26 = vadd.f32 %v1640_v4, %v154_v25  ;;  %1271 = vmatpush3.bf16.msra.mxu1 %v1292_v60  ;;  %v202_v29 = vmax.f32 %v152_v22, 0.0 }
  0xe6   :  { %v205_v28 = vmax.f32 %v163_v24, 0.0  ;;  %1264 = vmatprep.subr.bf16.mxu1 %v1293_v61 }
  0xe7   :  { %v203_v30 = vmax.f32 %v155_v26, 0.0 }
  0xe8   :  { %v217_v31 = vpack.c.bf16 %v205_v28, %v204_v27 }
  0xe9   :  { %v216_v32 = vpack.c.bf16 %v203_v30, %v202_v29  ;;  %v1173_v33 = vpop.f32.mrb[8].mxu0  ;;  %1272 = vmatpush3.bf16.msra.mxu1 %v1293_v61 }
  0xea   :  { %v176_v34 = vadd.f32 %v1173_v33, %v1640_v4  ;;  %v167_v35 = vpop.f32.mrb[9].mxu0  ;;  %1265 = vmatprep.subr.bf16.mxu1 %v1598_v62 }
  0xeb   :  { %v168_v36 = vadd.f32 %v1640_v4, %v167_v35  ;;  %v1174_v37 = vpop.f32.mrb[10].mxu0  ;;  %1199 = vmatprep.mubr.bf16.mxu1 %v216_v32 }
  0xec   :  { %v179_v38 = vadd.f32 %v1174_v37, %v1640_v4  ;;  %v170_v39 = vpop.f32.mrb[11].mxu0  ;;  %1200 = vmatmul.mubr.bf16.gmra.mrb[4].mxu1 %v217_v31  ;;  %v208_v41 = vmax.f32 %v176_v34, 0.0 }
  0xed   :  { %v171_v40 = vadd.f32 %v1640_v4, %v170_v39  ;;  %1273 = vmatpush3.bf16.msra.mxu1 %v1598_v62  ;;  %v206_v43 = vmax.f32 %v168_v36, 0.0 }
  0xee   :  { %v209_v42 = vmax.f32 %v179_v38, 0.0  ;;  %1266 = vmatprep.subr.bf16.mxu1 %v1605_v63 }
  0xef   :  { %v207_v44 = vmax.f32 %v171_v40, 0.0 }
  0xf0   :  { %v219_v45 = vpack.c.bf16 %v209_v42, %v208_v41 }
  0xf1   :  { %v218_v46 = vpack.c.bf16 %v207_v44, %v206_v43  ;;  %v1177_v47 = vpop.f32.mrb[12].mxu0  ;;  %1274 = vmatpush3.bf16.msra.mxu1 %v1605_v63 }
  0xf2   :  { %v192_v48 = vadd.f32 %v1177_v47, %v1640_v4  ;;  %v183_v49 = vpop.f32.mrb[13].mxu0  ;;  %1267 = vmatprep.subr.bf16.mxu1 %v1612_v0 }
  0xf3   :  { %v184_v50 = vadd.f32 %v1640_v4, %v183_v49  ;;  %v1178_v51 = vpop.f32.mrb[14].mxu0  ;;  %1203 = vmatprep.mubr.bf16.mxu1 %v218_v46 }
  0xf4   :  { %v195_v52 = vadd.f32 %v1178_v51, %v1640_v4  ;;  %v186_v53 = vpop.f32.mrb[15].mxu0  ;;  %1204 = vmatmul.mubr.bf16.gmra.mrb[8].mxu1 %v219_v45  ;;  %v212_v55 = vmax.f32 %v192_v48, 0.0 }
  0xf5   :  { %v187_v54 = vadd.f32 %v1640_v4, %v186_v53  ;;  %1275 = vmatpush3.bf16.msra.mxu1 %v1612_v0  ;;  %v210_v57 = vmax.f32 %v184_v50, 0.0 }
  0xf6   :  { %v213_v56 = vmax.f32 %v195_v52, 0.0  ;;  %1268 = vmatprep.subr.bf16.mxu1 %v1619_v1 }
  0xf7   :  { %v211_v58 = vmax.f32 %v187_v54, 0.0 }
  0xf8   :  { %v221_v60 = vpack.c.bf16 %v213_v56, %v212_v55 }
  0xf9   :  { %v220_v61 = vpack.c.bf16 %v211_v58, %v210_v57  ;;  %v1217_v62 = vpop.f32.mrb[16].mxu0  ;;  %1276 = vmatpush3.bf16.msra.mxu1 %v1619_v1 }
  0xfa   :  { %v505_v63 = vadd.f32 %v1217_v62, %v1668_v59  ;;  %v496_v4 = vpop.f32.mrb[17].mxu0  ;;  %1269 = vmatprep.subr.bf16.mxu1 %v1626_v2 }
  0xfb   :  { %v497_v0 = vadd.f32 %v1668_v59, %v496_v4  ;;  %1207 = vmatprep.mubr.bf16.mxu1 %v220_v61  ;;  %v1218_v5 = vpop.f32.mrb[18].mxu0 }
  0xfc   :  { %v508_v6 = vadd.f32 %v1218_v5, %v1668_v59  ;;  %1208 = vmatmul.mubr.bf16.gmra.mrb[12].mxu1 %v221_v60  ;;  %v499_v7 = vpop.f32.mrb[19].mxu0  ;;  %v561_v9 = vmax.f32 %v505_v63, 0.0 }
  0xfd   :  { %v500_v8 = vadd.f32 %v1668_v59, %v499_v7  ;;  %1277 = vmatpush3.bf16.msra.mxu1 %v1626_v2  ;;  %v559_v1 = vmax.f32 %v497_v0, 0.0 }
  0xfe   :  { %v562_v10 = vmax.f32 %v508_v6, 0.0  ;;  %1270 = vmatprep.subr.bf16.mxu1 %v1633_v3 }
  0xff   :  { %v560_v11 = vmax.f32 %v500_v8, 0.0 }
 0x100   :  { %v576_v12 = vpack.c.bf16 %v562_v10, %v561_v9  ;;  %v1704_v9 = vld [vmem:[%s1822_s5] ss:$0 sm:$0xff]  ;;  %s1388_s5 = smov [#allocation2]  }
 0x101   :  { %v575_v13 = vpack.c.bf16 %v560_v11, %v559_v1  ;;  %v1221_v14 = vpop.f32.mrb[20].mxu0  ;;  %1278 = vmatpush3.bf16.msra.mxu1 %v1633_v3  ;;  %v1709_v10 = vld [vmem:[%s1826_s9] ss:$0 sm:$0xff]  ;;  %s1047_s9 = sshll.u32 %s1388_s5, 4  ;;  %s1048_s9 = int_to_ptr.vmem [resolvable:$true] %s1047_s9 }
 0x102   :  { %v521_v15 = vadd.f32 %v1221_v14, %v1668_v59  ;;  %v512_v16 = vpop.f32.mrb[21].mxu0  ;;  %s1364_s26 = scalar_lea.vmem %s1048_s9, 16  ;;  %s1368_s27 = scalar_lea.vmem %s1048_s9, 32 }
 0x103   :  { %v513_v17 = vadd.f32 %v1668_v59, %v512_v16  ;;  %v1222_v18 = vpop.f32.mrb[22].mxu0  ;;  %1247 = vmatprep.mubr.bf16.mxu0 %v575_v13  ;;  %p1365_p0 = scmp.ne.s32.totalorder %s1048_s9, %s1364_s26  ;;  %p1369_p1 = scmp.lt.s32.totalorder %s1048_s9, %s1048_s9 }
 0x104   :  { %v524_v2 = vadd.f32 %v1222_v18, %v1668_v59  ;;  %v515_v19 = vpop.f32.mrb[23].mxu0  ;;  %1248 = vmatmul.mubr.bf16.vlgmr.msra.gmra.mrb[32].mxu0 %v576_v12  ;;  %v565_v21 = vmax.f32 %v521_v15, 0.0  ;;  %p1370_p2 = scmp.lt.s32.totalorder %s1368_s27, %s1364_s26 }
 0x105   :  { %v516_v20 = vadd.f32 %v1668_v59, %v515_v19  ;;  %v563_v23 = vmax.f32 %v513_v17, 0.0 }
 0x106   :  { %v566_v22 = vmax.f32 %v524_v2, 0.0  ;;  %p1371_p3 = por %p1370_p2, %p1369_p1 }
 0x107   :  { %v564_v24 = vmax.f32 %v516_v20, 0.0 }
 0x108   :  { %v578_v25 = vpack.c.bf16 %v566_v22, %v565_v21  ;;  %p1372_p4 = pnand %p1371_p3, %p1365_p0 }
 0x109   :  { %v577_v26 = vpack.c.bf16 %v564_v24, %v563_v23  ;;  %v1225_v3 = vpop.f32.mrb[24].mxu0 }
 0x10a   :  { %v537_v27 = vadd.f32 %v1225_v3, %v1668_v59  ;;  %v528_v28 = vpop.f32.mrb[25].mxu0 }
 0x10b   :  { %v529_v29 = vadd.f32 %v1668_v59, %v528_v28  ;;  %v1226_v30 = vpop.f32.mrb[26].mxu0  ;;  %1251 = vmatprep.mubr.bf16.mxu1 %v577_v26 }
 0x10c   :  { %v540_v31 = vadd.f32 %v1226_v30, %v1668_v59  ;;  %v531_v32 = vpop.f32.mrb[27].mxu0  ;;  %1252 = vmatmul.mubr.bf16.vlgmr.msra.gmra.mrb[16].mxu1 %v578_v25  ;;  %v569_v34 = vmax.f32 %v537_v27, 0.0 }
 0x10d   :  { %v532_v33 = vadd.f32 %v1668_v59, %v531_v32  ;;  %v567_v36 = vmax.f32 %v529_v29, 0.0 }
 0x10e   :  { %v570_v35 = vmax.f32 %v540_v31, 0.0 }
 0x10f   :  { %v568_v37 = vmax.f32 %v532_v33, 0.0 }
 0x110   :  { %v580_v38 = vpack.c.bf16 %v570_v35, %v569_v34 }
 0x111   :  { %v579_v39 = vpack.c.bf16 %v568_v37, %v567_v36  ;;  %v1229_v40 = vpop.f32.mrb[28].mxu0 }
 0x112   :  { %v553_v41 = vadd.f32 %v1229_v40, %v1668_v59  ;;  %v544_v42 = vpop.f32.mrb[29].mxu0 }
 0x113   :  { %v545_v43 = vadd.f32 %v1668_v59, %v544_v42  ;;  %v1230_v44 = vpop.f32.mrb[30].mxu0  ;;  %1255 = vmatprep.mubr.bf16.mxu1 %v579_v39 }
 0x114   :  { %v556_v45 = vadd.f32 %v1230_v44, %v1668_v59  ;;  %v547_v46 = vpop.f32.mrb[31].mxu0  ;;  %1256 = vmatmul.mubr.bf16.gmra.mrb[20].mxu1 %v580_v38  ;;  %v573_v48 = vmax.f32 %v553_v41, 0.0 }
 0x115   :  { %v548_v47 = vadd.f32 %v1668_v59, %v547_v46  ;;  %v571_v50 = vmax.f32 %v545_v43, 0.0 }
 0x116   :  { %v574_v49 = vmax.f32 %v556_v45, 0.0 }
 0x117   :  { %v572_v51 = vmax.f32 %v548_v47, 0.0 }
 0x118   :  { %v582_v52 = vpack.c.bf16 %v574_v49, %v573_v48 }
 0x119   :  { %v581_v53 = vpack.c.bf16 %v572_v51, %v571_v50 }
 0x11b   :  { %1259 = vmatprep.mubr.bf16.mxu1 %v581_v53 }
 0x11c   :  { %1260 = vmatmul.mubr.bf16.gmra.mrb[24].mxu1 %v582_v52 }
 0x1b7   :  { %v1197_v54 = vpop.f32.mrb[0].mxu1 }
 0x1b8   :  { %v327_v55 = vpop.f32.mrb[1].mxu1  ;;  %v336_v11 = vadd.f32 %v1197_v54, %v1704_v9 }
 0x1b9   :  { %v1198_v56 = vpop.f32.mrb[2].mxu1  ;;  %v328_v14 = vadd.f32 %v1704_v9, %v327_v55 }
 0x1ba   :  { %v330_v57 = vpop.f32.mrb[3].mxu1  ;;  %v339_v17 = vadd.f32 %v1198_v56, %v1704_v9 }
 0x1bb   :  { %v331_v20 = vadd.f32 %v1704_v9, %v330_v57 }
 0x1bf   :  { %v1201_v58 = vpop.f32.mrb[4].mxu1 }
 0x1c0   :  { %v343_v60 = vpop.f32.mrb[5].mxu1  ;;  %v352_v27 = vadd.f32 %v1201_v58, %v1704_v9 }
 0x1c1   :  { %v1202_v61 = vpop.f32.mrb[6].mxu1  ;;  %v344_v31 = vadd.f32 %v1704_v9, %v343_v60 }
 0x1c2   :  { %v346_v62 = vpop.f32.mrb[7].mxu1  ;;  %v355_v35 = vadd.f32 %v1202_v61, %v1704_v9 }
 0x1c3   :  { %v347_v39 = vadd.f32 %v1704_v9, %v346_v62 }
 0x1c7   :  { %v1205_v63 = vpop.f32.mrb[8].mxu1 }
 0x1c8   :  { %v359_v4 = vpop.f32.mrb[9].mxu1  ;;  %v368_v47 = vadd.f32 %v1205_v63, %v1704_v9 }
 0x1c9   :  { %v1206_v0 = vpop.f32.mrb[10].mxu1  ;;  %v360_v50 = vadd.f32 %v1704_v9, %v359_v4 }
 0x1ca   :  { %v1691_v59 = vpop.f32.mrb[11].mxu1  ;;  %v371_v54 = vadd.f32 %v1206_v0, %v1704_v9 }
 0x1cb   :  { %v363_v60 = vadd.f32 %v1704_v9, %v1691_v59 }
 0x1cf   :  { %v1693_v5 = vpop.f32.mrb[12].mxu1 }
 0x1d0   :  { %v1695_v6 = vpop.f32.mrb[13].mxu1 }
 0x1d1   :  { %v1697_v7 = vpop.f32.mrb[14].mxu1  ;;  %v376_v59 = vadd.f32 %v1704_v9, %v1695_v6 }
 0x1d2   :  { %v1699_v8 = vpop.f32.mrb[15].mxu1 }
 0x1d7   :  { %v1249_v1 = vpop.f32.mrb[32].mxu0 }
 0x1d8   :  { %v697_v12 = vadd.f32 %v1249_v1, %v1709_v10  ;;  %v688_v13 = vpop.f32.mrb[33].mxu0 }
 0x1d9   :  { %v689_v15 = vadd.f32 %v1709_v10, %v688_v13  ;;  %v1250_v16 = vpop.f32.mrb[34].mxu0 }
 0x1da   :  { %v700_v18 = vadd.f32 %v1250_v16, %v1709_v10  ;;  %v691_v2 = vpop.f32.mrb[35].mxu0  ;;  %v753_v19 = vmul.f32 %v697_v12, %v336_v11  ;;  %v384_v12 = vadd.f32 %v1693_v5, %v1704_v9 }
 0x1db   :  { %v692_v21 = vadd.f32 %v1709_v10, %v691_v2  ;;  %v751_v22 = vmul.f32 %v689_v15, %v328_v14 }
 0x1dc   :  { %v774_v23 = vsel %vm767_vm3, %v753_v19, 0.0  ;;  %v754_v24 = vmul.f32 %v700_v18, %v339_v17  ;;  %v387_v18 = vadd.f32 %v1697_v7, %v1704_v9 }
 0x1dd   :  { %775 = vadd.xlane.f32.xlu1 %v774_v23  ;;  %v768_v25 = vsel %vm767_vm3, %v751_v22, 0.0  ;;  %v752_v26 = vmul.f32 %v692_v21, %v331_v20  ;;  %v379_v21 = vadd.f32 %v1704_v9, %v1699_v8 }
 0x1de   :  { %769 = vadd.xlane.f32.xlu0 %v768_v25  ;;  %v777_v30 = vsel %vm767_vm3, %v754_v24, 0.0 }
 0x1df   :  { %v1253_v3 = vpop.f32.mrb[16].mxu1  ;;  %v771_v34 = vsel %vm767_vm3, %v752_v26, 0.0 }
 0x1e0   :  { %v713_v28 = vadd.f32 %v1253_v3, %v1709_v10  ;;  %v704_v29 = vpop.f32.mrb[17].mxu1 }
 0x1e1   :  { %v705_v32 = vadd.f32 %v1709_v10, %v704_v29  ;;  %778 = vadd.xlane.f32.xlu1 %v777_v30  ;;  %v1254_v33 = vpop.f32.mrb[18].mxu1 }
 0x1e2   :  { %v716_v36 = vadd.f32 %v1254_v33, %v1709_v10  ;;  %v707_v37 = vpop.f32.mrb[19].mxu1  ;;  %772 = vadd.xlane.f32.xlu0 %v771_v34  ;;  %v757_v38 = vmul.f32 %v713_v28, %v352_v27 }
 0x1e3   :  { %v708_v40 = vadd.f32 %v1709_v10, %v707_v37  ;;  %v755_v41 = vmul.f32 %v705_v32, %v344_v31 }
 0x1e4   :  { %v786_v42 = vsel %vm767_vm3, %v757_v38, 0.0  ;;  %v758_v43 = vmul.f32 %v716_v36, %v355_v35 }
 0x1e5   :  { %v756_v44 = vmul.f32 %v708_v40, %v347_v39  ;;  %v780_v53 = vsel %vm767_vm3, %v755_v41, 0.0 }
 0x1e6   :  { %787 = vadd.xlane.f32.xlu0 %v786_v42  ;;  %v789_v45 = vsel %vm767_vm3, %v758_v43, 0.0 }
 0x1e7   :  { %790 = vadd.xlane.f32.xlu1 %v789_v45  ;;  %v1257_v46 = vpop.f32.mrb[20].mxu1  ;;  %v783_v57 = vsel %vm767_vm3, %v756_v44, 0.0 }
 0x1e8   :  { %v729_v48 = vadd.f32 %v1257_v46, %v1709_v10  ;;  %v720_v49 = vpop.f32.mrb[21].mxu1 }
 0x1e9   :  { %v721_v51 = vadd.f32 %v1709_v10, %v720_v49  ;;  %v1258_v52 = vpop.f32.mrb[22].mxu1  ;;  %v928_v49 = vlaneseq }
 0x1ea   :  { %v732_v55 = vadd.f32 %v1258_v52, %v1709_v10  ;;  %v723_v56 = vpop.f32.mrb[23].mxu1  ;;  %781 = vadd.xlane.f32.xlu0 %v780_v53  ;;  %v761_v58 = vmul.f32 %v729_v48, %v368_v47 }
 0x1eb   :  { %v724_v61 = vadd.f32 %v1709_v10, %v723_v56  ;;  %784 = vadd.xlane.f32.xlu1 %v783_v57  ;;  %v759_v62 = vmul.f32 %v721_v51, %v360_v50 }
 0x1ec   :  { %v798_v63 = vsel %vm767_vm3, %v761_v58, 0.0  ;;  %v762_v4 = vmul.f32 %v732_v55, %v371_v54  ;;  %v1764_v58 = vand.u32 127, %v928_v49 }
 0x1ed   :  { %v760_v1 = vmul.f32 %v724_v61, %v363_v60  ;;  %v792_v17 = vsel %vm767_vm3, %v759_v62, 0.0 }
 0x1ee   :  { %799 = vadd.xlane.f32.xlu0 %v798_v63  ;;  %v801_v0 = vsel %vm767_vm3, %v762_v4, 0.0  ;;  %v934_v62 = vadd.s32 4294967288, %v1764_v58 }
 0x1ef   :  { %v1261_v11 = vpop.f32.mrb[24].mxu1  ;;  %802 = vadd.xlane.f32.xlu1 %v801_v0  ;;  %v795_v5 = vsel %vm767_vm3, %v760_v1, 0.0 }
 0x1f0   :  { %v745_v13 = vadd.f32 %v1261_v11, %v1709_v10  ;;  %v736_v14 = vpop.f32.mrb[25].mxu1  ;;  %v1767_v11 = vshrl.u32 %v928_v49, 7 }
 0x1f1   :  { %v737_v15 = vadd.f32 %v1709_v10, %v736_v14  ;;  %v1262_v16 = vpop.f32.mrb[26].mxu1  ;;  %v941_v14 = vadd.s32 4294967280, %v1764_v58 }
 0x1f2   :  { %v748_v2 = vadd.f32 %v1262_v16, %v1709_v10  ;;  %v739_v19 = vpop.f32.mrb[27].mxu1  ;;  %793 = vadd.xlane.f32.xlu0 %v792_v17  ;;  %v765_v20 = vmul.f32 %v745_v13, %v384_v12  ;;  %v937_v16 = vsub.s32 %v934_v62, %v1767_v11 }
 0x1f3   :  { %v740_v6 = vadd.f32 %v1709_v10, %v739_v19  ;;  %796 = vadd.xlane.f32.xlu1 %v795_v5  ;;  %v763_v22 = vmul.f32 %v737_v15, %v376_v59 }
 0x1f4   :  { %v766_v23 = vmul.f32 %v748_v2, %v387_v18  ;;  %v810_v26 = vsel %vm767_vm3, %v765_v20, 0.0 }
 0x1f5   :  { %v804_v24 = vsel %vm767_vm3, %v763_v22, 0.0  ;;  %v764_v25 = vmul.f32 %v740_v6, %v379_v21  ;;  %v932_v21 = vsub.s32 %v1764_v58, %v1767_v11 }
 0x1f6   :  { %805 = vadd.xlane.f32.xlu0 %v804_v24  ;;  %v813_v3 = vsel %vm767_vm3, %v766_v23, 0.0  ;;  %v944_v23 = vsub.s32 %v941_v14, %v1767_v11  ;;  %v948_v24 = vadd.s32 4294967272, %v1764_v58 }
 0x1f7   :  { %v807_v7 = vsel %vm767_vm3, %v764_v25, 0.0 }
 0x1f8   :  { %808 = vadd.xlane.f32.xlu1 %v807_v7 }
 0x1fa   :  { %811 = vadd.xlane.f32.xlu0 %v810_v26 }
 0x1fc   :  { %814 = vadd.xlane.f32.xlu1 %v813_v3  ;;  %v969_v3 = vadd.s32 4294967248, %v1764_v58 }
 0x26a   :  { %v776_v27 = vpop.xlane.xlu1 %775 }
 0x26b   :  { %v1096_v8 = vmul.f32 -1.442695, %v776_v27  ;;  %v770_v9 = vpop.xlane.xlu0 %769  ;;  %v1777_v27 = vadd.s32 4294967240, %v1764_v58 }
 0x26c   :  { %v1094_v10 = vmul.f32 -1.442695, %v770_v9  ;;  %v955_v9 = vadd.s32 4294967264, %v1764_v58 }
 0x26d   :  { %1300 = vpow2.f32 %v1096_v8 }
 0x26e   :  { %1302 = vpow2.f32 %v1094_v10  ;;  %v779_v28 = vpop.xlane.xlu1 %778 }
 0x26f   :  { %v1097_v29 = vmul.f32 -1.442695, %v779_v28  ;;  %v773_v30 = vpop.xlane.xlu0 %772 }
 0x270   :  { %v1095_v31 = vmul.f32 -1.442695, %v773_v30  ;;  %v962_v30 = vadd.s32 4294967256, %v1764_v58 }
 0x271   :  { %1304 = vpow2.f32 %v1097_v29 }
 0x272   :  { %1306 = vpow2.f32 %v1095_v31 }
 0x273   :  { %v788_v32 = vpop.xlane.xlu0 %787 }
 0x274   :  { %v1100_v33 = vmul.f32 -1.442695, %v788_v32  ;;  %v791_v34 = vpop.xlane.xlu1 %790 }
 0x275   :  { %v1101_v35 = vmul.f32 -1.442695, %v791_v34  ;;  %v951_v34 = vsub.s32 %v948_v24, %v1767_v11 }
 0x276   :  { %1308 = vpow2.f32 %v1100_v33 }
 0x277   :  { %v1301_v36 = vpop.eup %1300  ;;  %1310 = vpow2.f32 %v1101_v35  ;;  %v782_v37 = vpop.xlane.xlu0 %781 }
 0x278   :  { %v1303_v38 = vpop.eup %1302  ;;  %v866_v39 = vadd.f32 1.0, %v1301_v36  ;;  %v1098_v40 = vmul.f32 -1.442695, %v782_v37  ;;  %v785_v41 = vpop.xlane.xlu1 %784  ;;  %v972_v37 = vsub.s32 %v969_v3, %v1767_v11 }
 0x279   :  { %v1099_v42 = vmul.f32 -1.442695, %v785_v41  ;;  %v864_v43 = vadd.f32 1.0, %v1303_v38  ;;  %v979_v38 = vsub.s32 %v1777_v27, %v1767_v11  ;;  %v958_v41 = vsub.s32 %v955_v9, %v1767_v11 }
 0x27a   :  { %1312 = vrcp.f32 %v866_v39 }
 0x27b   :  { %v1305_v44 = vpop.eup %1304  ;;  %v800_v45 = vpop.xlane.xlu0 %799  ;;  %1314 = vpow2.f32 %v1098_v40 }
 0x27c   :  { %v1307_v46 = vpop.eup %1306  ;;  %v1104_v47 = vmul.f32 -1.442695, %v800_v45  ;;  %v803_v48 = vpop.xlane.xlu1 %802  ;;  %1316 = vpow2.f32 %v1099_v42  ;;  %v867_v52 = vadd.f32 1.0, %v1305_v44  ;;  %v965_v44 = vsub.s32 %v962_v30, %v1767_v11 }
 0x27d   :  { %v865_v50 = vadd.f32 1.0, %v1307_v46  ;;  %v1105_v51 = vmul.f32 -1.442695, %v803_v48  ;;  %1318 = vrcp.f32 %v864_v43  ;;  %v983_v45 = vadd.s32 4294967232, %v1764_v58 }
 0x27f   :  { %1320 = vrcp.f32 %v865_v50  ;;  %v794_v53 = vpop.xlane.xlu0 %793 }
 0x280   :  { %v1309_v54 = vpop.eup %1308  ;;  %1322 = vpow2.f32 %v1104_v47  ;;  %v1102_v55 = vmul.f32 -1.442695, %v794_v53  ;;  %v797_v56 = vpop.xlane.xlu1 %796 }
 0x281   :  { %v1311_v57 = vpop.eup %1310  ;;  %v870_v60 = vadd.f32 1.0, %v1309_v54  ;;  %1324 = vpow2.f32 %v1105_v51  ;;  %v1103_v61 = vmul.f32 -1.442695, %v797_v56  ;;  %v997_v51 = vadd.s32 4294967216, %v1764_v58 }
 0x282   :  { %1326 = vpow2.f32 %v1102_v55  ;;  %v871_v63 = vadd.f32 1.0, %v1311_v57  ;;  %v990_v55 = vadd.s32 4294967224, %v1764_v58 }
 0x283   :  { %1328 = vrcp.f32 %v867_v52  ;;  %v806_v4 = vpop.xlane.xlu0 %805 }
 0x284   :  { %1330 = vrcp.f32 %v870_v60  ;;  %v1106_v1 = vmul.f32 -1.442695, %v806_v4  ;;  %v1313_v0 = vpop.eup %1312 }
 0x285   :  { %1332 = vpow2.f32 %v1103_v61  ;;  %v809_v12 = vpop.xlane.xlu1 %808  ;;  %v1315_v13 = vpop.eup %1314  ;;  %v945_v40 = vrot.slane %v1313_v0, %v944_v23  ;;  %v986_v61 = vsub.s32 %v983_v45, %v1767_v11  ;;  %v1011_v0 = vadd.s32 4294967200, %v1764_v58 }
 0x286   :  { %1334 = vpow2.f32 %v1106_v1  ;;  %v1107_v59 = vmul.f32 -1.442695, %v809_v12  ;;  %v1317_v15 = vpop.eup %1316  ;;  %v868_v17 = vadd.f32 1.0, %v1315_v13  ;;  %v1004_v13 = vadd.s32 4294967208, %v1764_v58 }
 0x287   :  { %1336 = vrcp.f32 %v871_v63  ;;  %v812_v18 = vpop.xlane.xlu0 %811  ;;  %v1319_v2 = vpop.eup %1318  ;;  %v869_v19 = vadd.f32 1.0, %v1317_v15  ;;  %v1018_v15 = vadd.s32 4294967192, %v1764_v58  ;;  %v1025_v23 = vadd.s32 4294967184, %v1764_v58 }
 0x288   :  { %1338 = vpow2.f32 %v1107_v59  ;;  %v1108_v5 = vmul.f32 -1.442695, %v812_v18  ;;  %v933_v29 = vrot.slane %v1319_v2, %v932_v21  ;;  %v993_v18 = vsub.s32 %v990_v55, %v1767_v11 }
 0x289   :  { %v1321_v20 = vpop.eup %1320  ;;  %1340 = vrcp.f32 %v868_v17  ;;  %v815_v6 = vpop.xlane.xlu1 %814  ;;  %v1028_v30 = vsub.s32 %v1025_v23, %v1767_v11 }
 0x28a   :  { %v1323_v22 = vpop.eup %1322  ;;  %1342 = vrcp.f32 %v869_v19  ;;  %v1109_v25 = vmul.f32 -1.442695, %v815_v6  ;;  %v938_v26 = vrot.slane %v1321_v20, %v937_v16  ;;  %v1000_v19 = vsub.s32 %v997_v51, %v1767_v11 }
 0x28b   :  { %v1325_v7 = vpop.eup %1324  ;;  %1344 = vpow2.f32 %v1108_v5  ;;  %v874_v10 = vadd.f32 1.0, %v1323_v22  ;;  %v1014_v20 = vsub.s32 %v1011_v0, %v1767_v11  ;;  %v1007_v6 = vsub.s32 %v1004_v13, %v1767_v11 }
 0x28c   :  { %v1327_v8 = vpop.eup %1326  ;;  %1346 = vpow2.f32 %v1109_v25  ;;  %v875_v31 = vadd.f32 1.0, %v1325_v7  ;;  %v940_v36 = vsel %vm939_vm4, %v938_v26, %v933_v29  ;;  %v1021_v7 = vsub.s32 %v1018_v15, %v1767_v11 }
 0x28d   :  { %v1329_v28 = vpop.eup %1328  ;;  %v872_v32 = vadd.f32 1.0, %v1327_v8  ;;  %v947_v48 = vsel %vm946_vm5, %v945_v40, %v940_v36  ;;  %v1032_v26 = vadd.s32 4294967176, %v1764_v58 }
 0x28e   :  { %v1331_v33 = vpop.eup %1330  ;;  %v952_v50 = vrot.slane %v1329_v28, %v951_v34 }
 0x28f   :  { %v1333_v35 = vpop.eup %1332  ;;  %1348 = vrcp.f32 %v872_v32  ;;  %v973_v63 = vrot.slane %v1331_v33, %v972_v37  ;;  %v1035_v33 = vsub.s32 %v1032_v26, %v1767_v11 }
 0x290   :  { %v1335_v39 = vpop.eup %1334  ;;  %1350 = vrcp.f32 %v874_v10  ;;  %v873_v42 = vadd.f32 1.0, %v1333_v35  ;;  %v954_v57 = vsel %vm953_vm6, %v952_v50, %v947_v48 }
 0x291   :  { %v1337_v43 = vpop.eup %1336  ;;  %1352 = vrcp.f32 %v875_v31  ;;  %v876_v46 = vadd.f32 1.0, %v1335_v39 }
 0x292   :  { %v1339_v47 = vpop.eup %1338  ;;  %1354 = vrcp.f32 %v873_v42  ;;  %v980_v17 = vrot.slane %v1337_v43, %v979_v38 }
 0x293   :  { %v1341_v49 = vpop.eup %1340  ;;  %1356 = vrcp.f32 %v876_v46  ;;  %v877_v52 = vadd.f32 1.0, %v1339_v47 }
 0x294   :  { %v1343_v53 = vpop.eup %1342  ;;  %v959_v54 = vrot.slane %v1341_v49, %v958_v41 }
 0x295   :  { %v1345_v56 = vpop.eup %1344  ;;  %v966_v60 = vrot.slane %v1343_v53, %v965_v44  ;;  %1358 = vrcp.f32 %v877_v52 }
 0x296   :  { %v1347_v62 = vpop.eup %1346  ;;  %v961_v4 = vsel %vm960_vm7, %v959_v54, %v954_v57  ;;  %v878_v1 = vadd.f32 1.0, %v1345_v56 }
 0x297   :  { %v968_v12 = vsel %vm967_vm8, %v966_v60, %v961_v4  ;;  %v879_v14 = vadd.f32 1.0, %v1347_v62 }
 0x298   :  { %v975_v59 = vsel %vm974_vm9, %v973_v63, %v968_v12  ;;  %1360 = vrcp.f32 %v878_v1 }
 0x299   :  { %v1349_v16 = vpop.eup %1348  ;;  %1362 = vrcp.f32 %v879_v14  ;;  %v982_v22 = vsel %vm981_vm10, %v980_v17, %v975_v59 }
 0x29a   :  { %v1351_v2 = vpop.eup %1350  ;;  %v987_v5 = vrot.slane %v1349_v16, %v986_v61 }
 0x29b   :  { %v1353_v21 = vpop.eup %1352  ;;  %v1001_v8 = vrot.slane %v1351_v2, %v1000_v19 }
 0x29c   :  { %v1355_v24 = vpop.eup %1354  ;;  %v989_v25 = vsel %vm988_vm11, %v987_v5, %v982_v22  ;;  %v1008_v28 = vrot.slane %v1353_v21, %v1007_v6 }
 0x29d   :  { %v1357_v3 = vpop.eup %1356  ;;  %v994_v27 = vrot.slane %v1355_v24, %v993_v18 }
 0x29e   :  { %v1015_v9 = vrot.slane %v1357_v3, %v1014_v20 }
 0x29f   :  { %v1359_v10 = vpop.eup %1358  ;;  %v996_v29 = vsel %vm995_vm12, %v994_v27, %v989_v25 }
 0x2a0   :  { %v1003_v31 = vsel %vm1002_vm13, %v1001_v8, %v996_v29  ;;  %v1022_v32 = vrot.slane %v1359_v10, %v1021_v7 }
 0x2a1   :  { %v1010_v34 = vsel %vm1009_vm14, %v1008_v28, %v1003_v31 }
 0x2a2   :  { %v1361_v35 = vpop.eup %1360  ;;  %v1017_v58 = vsel %vm1016_vm15, %v1015_v9, %v1010_v34 }
 0x2a3   :  { %v1363_v36 = vpop.eup %1362  ;;  %v1024_v37 = vsel %vm1023_vm0, %v1022_v32, %v1017_v58  ;;  %v1029_v38 = vrot.slane %v1361_v35, %v1028_v30 }
 0x2a4   :  { %v1036_v39 = vrot.slane %v1363_v36, %v1035_v33 }
 0x2a5   :  { %v1031_v40 = vsel %vm1030_vm1, %v1029_v38, %v1024_v37 }
 0x2a6   :  { %v1038_v41 = vsel %vm1037_vm2, %v1036_v39, %v1031_v40 }
 0x2a7   :  { %1040 = vst [vmem:[#allocation2] sm:$0x1] %v1038_v41 }
 0x2a8   :  { %1375 = shalt.err (!%p1372_p4)
}
 0x2a9   :  { %s1376_s30 = scalar_lea.hbm %s1827_s10, 16 }
 0x2aa   :  { %p1377_p5 = scmp.ne.s32.totalorder %s1827_s10, %s1376_s30  ;;  %p1380_p6 = scmp.lt.u32.totalorder %s1376_s30, %s1827_s10 }
 0x2ac   :  { %p1382_p7 = pnand %p1380_p6, %p1377_p5 }
 0x2ae   :  { %1385 = shalt.err (!%p1382_p7)
}
 0x2af   :  { %1050 = dma.vmem_to_hbm [thread:$0]  %s1048_s9, 16, %s1827_s10, [#allocation3]  }
 0x2b0   :  { %1386 = dma.done.wait [#allocation3], 16  }
 0x2b1   :  { %1387 = vsyncadd [#allocation3], 4294967280 }
 0x2b2   :  { %1054 = vsyncpa [#allocation3], 1 }

</bundles_post_ra>
